<compile_context>
chip_gen: v6e
topology: v6e:2x2x1
jax: 0.10.0
libtpu: 0.0.40
codegen_flags: <defaults>
</compile_context>

<pallas_src>
import jax
import jax.numpy as jnp
from jax import lax
from jax.experimental import pallas as pl
from jax.experimental.pallas import tpu as pltpu

LATENT_SIZE = 1536
PROTOTYPE_SIZE = 50
NUM_CLASSES = 6
NUM_PROTOTYPES = 12        # args.n_proto
NUM_SLOTS_PER_CLASS = 2    # args.n_slots
EPS_SIM = 1e-5             # self.epsilon
EPS_IN = 1e-5              # InstanceNorm1d default eps

# lane-dense packed output layout: [x_proj | sim | out2 | zero pad] = 128 lanes
PACK_W = 128
COL_XPROJ = 0
COL_SIM = PROTOTYPE_SIZE
COL_OUT = PROTOTYPE_SIZE + NUM_PROTOTYPES
PACK_USED = PROTOTYPE_SIZE + NUM_PROTOTYPES + NUM_CLASSES  # 68

TB_MAX = 1024              # max batch-tile rows per grid step


def _round_up(n, m):
    return ((n + m - 1) // m) * m


def _cdiv(a, b):
    return (a + b - 1) // b


def _softmax_last(a):
    m = jnp.max(a, axis=-1, keepdims=True)
    e = jnp.exp(a - m)
    return e / jnp.sum(e, axis=-1, keepdims=True)


def _project(h_bf16, w1t_bf16, b1, w2t, b2):
    """Linear(1536,50) -> InstanceNorm1d -> ReLU -> Linear(50,50), f32 after matmul."""
    # bf16 x bf16 -> f32 accumulate on the MXU
    h = jnp.dot(h_bf16, w1t_bf16, preferred_element_type=jnp.float32) + b1
    # InstanceNorm1d on (N, 50): per-row normalization over features (biased var).
    # Variance via E[h^2] - mean^2: two independent lane reductions (no serial chain).
    mean = jnp.mean(h, axis=-1, keepdims=True)
    var = jnp.maximum(jnp.mean(h * h, axis=-1, keepdims=True) - mean * mean, 0.0)
    h = (h - mean) * lax.rsqrt(var + EPS_IN)
    # ReLU
    h = jnp.maximum(h, 0.0)
    # Linear(50,50) in f32
    h = jnp.dot(h, w2t, preferred_element_type=jnp.float32) + b2
    return h


# --------------------------------------------------------------------------- #
# Main kernel: gridded over the batch; weights / prototype stats are resident.
# --------------------------------------------------------------------------- #
def main_kernel(x_ref, w1t_ref, b1_ref, w2t_ref, b2_ref,
                pproj_ref, psq_ref, ppc_ref, out_ref):
    # projection network on this batch tile (bf16 inputs, f32 everywhere after)
    x_proj = _project(x_ref[...], w1t_ref[...], b1_ref[...],
                      w2t_ref[...], b2_ref[...])                     # (TB, 50) f32

    # prototype layer via the matmul expansion ||x||^2 + ||p||^2 - 2 x.p (MXU, f32)
    x_sq = jnp.sum(x_proj * x_proj, axis=-1, keepdims=True)          # (TB, 1)
    cross = lax.dot_general(x_proj, pproj_ref[...],
                            (((1,), (1,)), ((), ())),
                            preferred_element_type=jnp.float32)      # (TB, P)
    l2 = jnp.maximum(x_sq + psq_ref[...] - 2.0 * cross, 0.0)
    sim = jnp.log(l2 + 1.0) - jnp.log(l2 + EPS_SIM)                  # (TB, P)

    # mixed-similarity einsum + class_identity_layer folded into one small matmul
    out1 = lax.dot_general(sim, ppc_ref[...],
                           (((1,), (1,)), ((), ())),
                           preferred_element_type=jnp.float32)       # (TB, C)
    out2 = _softmax_last(out1)

    # single lane-dense (TB, 128) store instead of three narrow masked outputs
    pad = jnp.zeros((x_proj.shape[0], PACK_W - PACK_USED), jnp.float32)
    out_ref[...] = jnp.concatenate([x_proj, sim, out2, pad], axis=-1)


# --------------------------------------------------------------------------- #
# Parameters (pre-transposed / pre-cast once at init time, PyTorch init dists).
# --------------------------------------------------------------------------- #
def init_params(key):
    kp, kpp, kw1, kb1, kw2, kb2 = jax.random.split(key, 6)
    C, P, S = NUM_CLASSES, NUM_PROTOTYPES, NUM_SLOTS_PER_CLASS
    # prototypes ~ randn (default path: args.new_proto_init == False)
    prototypes = jax.random.normal(kp, (P, LATENT_SIZE), jnp.float32)
    # proto_presence: xavier_normal_ on (C, P, S): fan_in = P*S, fan_out = C*S
    std = (2.0 / (P * S + C * S)) ** 0.5
    proto_presence = std * jax.random.normal(kpp, (C, P, S), jnp.float32)
    pp_flat = jnp.transpose(proto_presence, (0, 2, 1)).reshape(C * S, P)  # (C*S, P)
    # projection_network linears: U(-1/sqrt(fan_in), 1/sqrt(fan_in)), stored transposed
    lim1 = 1.0 / (LATENT_SIZE ** 0.5)
    w1t = jax.random.uniform(kw1, (LATENT_SIZE, PROTOTYPE_SIZE), jnp.float32, -lim1, lim1)
    b1 = jax.random.uniform(kb1, (1, PROTOTYPE_SIZE), jnp.float32, -lim1, lim1)
    lim2 = 1.0 / (PROTOTYPE_SIZE ** 0.5)
    w2t = jax.random.uniform(kw2, (PROTOTYPE_SIZE, PROTOTYPE_SIZE), jnp.float32, -lim2, lim2)
    b2 = jax.random.uniform(kb2, (1, PROTOTYPE_SIZE), jnp.float32, -lim2, lim2)
    # class_identity_layer weight (C, C*S): wc[c, i] = 1 if i // S == c else 0
    idx = jnp.arange(C * S) // S
    wc = (idx[None, :] == jnp.arange(C)[:, None]).astype(jnp.float32)
    # w1t stored in bf16 once (MXU-native on v5e/v6e/v7x; halves its HBM/VMEM bytes)
    return dict(prototypes=prototypes, pp_flat=pp_flat,
                w1t=w1t.astype(jnp.bfloat16), b1=b1, w2t=w2t, b2=b2, wc=wc)


# --------------------------------------------------------------------------- #
# Forward
# --------------------------------------------------------------------------- #
def sharedpwnet_forward(x, params, gumbel_scalar=0.0, tau=1.0):
    assert gumbel_scalar == 0.0, "only the deterministic softmax branch is implemented"
    del tau  # unused when gumbel_scalar == 0
    B = x.shape[0]
    C, P, S = NUM_CLASSES, NUM_PROTOTYPES, NUM_SLOTS_PER_CLASS

    # ---- batch-independent prep in plain JAX (tiny: 12x1536x50 matmul + softmax) ----
    proto_proj = _project(params["prototypes"].astype(jnp.bfloat16), params["w1t"],
                          params["b1"], params["w2t"], params["b2"])      # (P, 50) f32
    proto_sq = jnp.sum(proto_proj * proto_proj, axis=-1)[None, :]         # (1, P)
    pp_sm = _softmax_last(params["pp_flat"])                              # (C*S, P)
    pp_class = jnp.dot(params["wc"], pp_sm,
                       preferred_element_type=jnp.float32)                # (C, P)

    # ---- padding-aware batch tiling (>=2 tiles at moderate B for v7x's 2 TCs) ----
    num_tiles = max(1, _cdiv(B, TB_MAX))
    if num_tiles == 1 and B > 256:
        num_tiles = 2
    TB = _round_up(_cdiv(B, num_tiles), 8)
    B_pad = TB * num_tiles
    x_p = jnp.pad(x, ((0, B_pad - B), (0, 0))) if B_pad != B else x
    x_p = x_p.astype(jnp.bfloat16)   # bf16 activation path for the 1536->50 matmul

    flops = 2 * B_pad * (LATENT_SIZE * PROTOTYPE_SIZE + PROTOTYPE_SIZE * PROTOTYPE_SIZE
                         + PROTOTYPE_SIZE * P + P * C)
    transcendentals = B_pad * (2 * P + C + 1)          # 2 logs/proto, softmax exps, rsqrt
    bytes_accessed = (B_pad * (LATENT_SIZE * 2 + PACK_W * 4)
                      + LATENT_SIZE * PROTOTYPE_SIZE * 2
                      + (PROTOTYPE_SIZE * PROTOTYPE_SIZE + 2 * PROTOTYPE_SIZE
                         + P * PROTOTYPE_SIZE + P + C * P) * 4)

    packed = pl.pallas_call(
        main_kernel,
        grid=(num_tiles,),
        in_specs=[
            pl.BlockSpec((TB, LATENT_SIZE), lambda i: (i, 0)),               # x tile (bf16)
            pl.BlockSpec((LATENT_SIZE, PROTOTYPE_SIZE), lambda i: (0, 0)),   # w1t (bf16, resident)
            pl.BlockSpec((1, PROTOTYPE_SIZE), lambda i: (0, 0)),             # b1
            pl.BlockSpec((PROTOTYPE_SIZE, PROTOTYPE_SIZE), lambda i: (0, 0)),# w2t
            pl.BlockSpec((1, PROTOTYPE_SIZE), lambda i: (0, 0)),             # b2
            pl.BlockSpec((P, PROTOTYPE_SIZE), lambda i: (0, 0)),             # proto_proj
            pl.BlockSpec((1, P), lambda i: (0, 0)),                          # proto_sq
            pl.BlockSpec((C, P), lambda i: (0, 0)),                          # pp_class
        ],
        out_specs=pl.BlockSpec((TB, PACK_W), lambda i: (i, 0)),
        out_shape=jax.ShapeDtypeStruct((B_pad, PACK_W), jnp.float32),
        compiler_params=pltpu.CompilerParams(dimension_semantics=("parallel",)),
        cost_estimate=pl.CostEstimate(flops=flops,
                                      transcendentals=transcendentals,
                                      bytes_accessed=bytes_accessed),
    )(x_p, params["w1t"], params["b1"], params["w2t"], params["b2"],
      proto_proj, proto_sq, pp_class)

    x_proj = packed[:B, COL_XPROJ:COL_XPROJ + PROTOTYPE_SIZE]
    sim = packed[:B, COL_SIM:COL_SIM + P]
    out2 = packed[:B, COL_OUT:COL_OUT + C]
    # back to the PyTorch (C, P, S) layout for the returned proto_presence
    proto_presence = jnp.transpose(pp_sm.reshape(C, S, P), (0, 2, 1))
    return out2, x_proj, sim, proto_presence


if __name__ == "__main__":
    key = jax.random.PRNGKey(0)
    kx, kparams = jax.random.split(key)
    params = init_params(kparams)

    B = 4
    x = jax.random.normal(kx, (B, LATENT_SIZE), jnp.float32)

    out2, x_proj, sim, proto_presence = sharedpwnet_forward(
        x, params, gumbel_scalar=0.0, tau=1.0)
    jax.block_until_ready((out2, x_proj, sim, proto_presence))

    assert out2.shape == (B, NUM_CLASSES)
    assert x_proj.shape == (B, PROTOTYPE_SIZE)
    assert sim.shape == (B, NUM_PROTOTYPES)
    assert proto_presence.shape == (NUM_CLASSES, NUM_PROTOTYPES, NUM_SLOTS_PER_CLASS)
    assert bool(jnp.all(jnp.isfinite(out2)))
    assert bool(jnp.allclose(jnp.sum(out2, axis=-1), 1.0, atol=1e-4))
    print("KERNEL_OK")
</pallas_src>

<mosaic_0001>
module attributes {stable_mosaic.version = 11 : i64} {
  func.func @main_kernel(%arg0: i32, %arg1: memref<8x1536xbf16, #tpu.memory_space<vmem>>, %arg2: memref<1536x50xbf16, #tpu.memory_space<vmem>>, %arg3: memref<1x50xf32, #tpu.memory_space<vmem>>, %arg4: memref<50x50xf32, #tpu.memory_space<vmem>>, %arg5: memref<1x50xf32, #tpu.memory_space<vmem>>, %arg6: memref<12x50xf32, #tpu.memory_space<vmem>>, %arg7: memref<1x12xf32, #tpu.memory_space<vmem>>, %arg8: memref<6x12xf32, #tpu.memory_space<vmem>>, %arg9: memref<8x128xf32, #tpu.memory_space<vmem>>) attributes {dimension_semantics = [#tpu.dimension_semantics<parallel>], iteration_bounds = array<i64: 1>, scalar_prefetch = 0 : i64, scratch_operands = 0 : i64, tpu.core_type = #tpu.core_type<tc>, window_params = [{transform_indices = @transform_0, window_bounds = array<i64: 8, 1536>}, {pipeline_mode = #tpu.pipeline_mode<synchronous>, transform_indices = @transform_1, window_bounds = array<i64: 1536, 50>}, {pipeline_mode = #tpu.pipeline_mode<synchronous>, transform_indices = @transform_2, window_bounds = array<i64: 1, 50>}, {pipeline_mode = #tpu.pipeline_mode<synchronous>, transform_indices = @transform_3, window_bounds = array<i64: 50, 50>}, {pipeline_mode = #tpu.pipeline_mode<synchronous>, transform_indices = @transform_4, window_bounds = array<i64: 1, 50>}, {pipeline_mode = #tpu.pipeline_mode<synchronous>, transform_indices = @transform_5, window_bounds = array<i64: 12, 50>}, {pipeline_mode = #tpu.pipeline_mode<synchronous>, transform_indices = @transform_6, window_bounds = array<i64: 1, 12>}, {pipeline_mode = #tpu.pipeline_mode<synchronous>, transform_indices = @transform_7, window_bounds = array<i64: 6, 12>}, {transform_indices = @transform_8, window_bounds = array<i64: 8, 128>}]} {
    %c0 = arith.constant 0 : index
    %c0_0 = arith.constant 0 : index
    %0 = vector.load %arg1[%c0, %c0_0] : memref<8x1536xbf16, #tpu.memory_space<vmem>>, vector<8x1536xbf16>
    %c0_1 = arith.constant 0 : index
    %c0_2 = arith.constant 0 : index
    %1 = vector.load %arg2[%c0_1, %c0_2] : memref<1536x50xbf16, #tpu.memory_space<vmem>>, vector<1536x50xbf16>
    %c0_3 = arith.constant 0 : index
    %c0_4 = arith.constant 0 : index
    %2 = vector.load %arg3[%c0_3, %c0_4] : memref<1x50xf32, #tpu.memory_space<vmem>>, vector<1x50xf32>
    %c0_5 = arith.constant 0 : index
    %c0_6 = arith.constant 0 : index
    %3 = vector.load %arg4[%c0_5, %c0_6] : memref<50x50xf32, #tpu.memory_space<vmem>>, vector<50x50xf32>
    %c0_7 = arith.constant 0 : index
    %c0_8 = arith.constant 0 : index
    %4 = vector.load %arg5[%c0_7, %c0_8] : memref<1x50xf32, #tpu.memory_space<vmem>>, vector<1x50xf32>
    %cst = arith.constant dense<0.000000e+00> : vector<8x50xf32>
    %5 = tpu.matmul %0, %1, %cst {dimension_numbers = #tpu.dot_dimension_numbers<[1], [0], [0], [1], [0, 0, 1, 1], [], []>} : vector<8x1536xbf16>, vector<1536x50xbf16>, vector<8x50xf32> -> vector<8x50xf32>
    %6 = vector.broadcast %2 : vector<1x50xf32> to vector<8x50xf32>
    %7 = arith.addf %5, %6 : vector<8x50xf32>
    %cst_9 = arith.constant dense<0.000000e+00> : vector<8xf32>
    %8 = vector.multi_reduction <add>, %7, %cst_9 [1] : vector<8x50xf32> to vector<8xf32>
    %9 = vector.shape_cast %8 : vector<8xf32> to vector<8x1xf32>
    %cst_10 = arith.constant 5.000000e+01 : f32
    %10 = vector.broadcast %cst_10 : f32 to vector<8x1xf32>
    %11 = arith.divf %9, %10 : vector<8x1xf32>
    %12 = arith.mulf %7, %7 : vector<8x50xf32>
    %cst_11 = arith.constant dense<0.000000e+00> : vector<8xf32>
    %13 = vector.multi_reduction <add>, %12, %cst_11 [1] : vector<8x50xf32> to vector<8xf32>
    %14 = vector.shape_cast %13 : vector<8xf32> to vector<8x1xf32>
    %cst_12 = arith.constant 5.000000e+01 : f32
    %15 = vector.broadcast %cst_12 : f32 to vector<8x1xf32>
    %16 = arith.divf %14, %15 : vector<8x1xf32>
    %17 = arith.mulf %11, %11 : vector<8x1xf32>
    %18 = arith.subf %16, %17 : vector<8x1xf32>
    %cst_13 = arith.constant 0.000000e+00 : f32
    %19 = vector.broadcast %cst_13 : f32 to vector<8x1xf32>
    %20 = arith.maximumf %18, %19 : vector<8x1xf32>
    %21 = vector.broadcast %11 : vector<8x1xf32> to vector<8x50xf32>
    %22 = arith.subf %7, %21 : vector<8x50xf32>
    %cst_14 = arith.constant 9.99999974E-6 : f32
    %23 = vector.broadcast %cst_14 : f32 to vector<8x1xf32>
    %24 = arith.addf %20, %23 : vector<8x1xf32>
    %25 = math.rsqrt %24 : vector<8x1xf32>
    %26 = vector.broadcast %25 : vector<8x1xf32> to vector<8x50xf32>
    %27 = arith.mulf %22, %26 : vector<8x50xf32>
    %cst_15 = arith.constant 0.000000e+00 : f32
    %28 = vector.broadcast %cst_15 : f32 to vector<8x50xf32>
    %29 = arith.maximumf %27, %28 : vector<8x50xf32>
    %cst_16 = arith.constant dense<0.000000e+00> : vector<8x50xf32>
    %30 = tpu.matmul %29, %3, %cst_16 {dimension_numbers = #tpu.dot_dimension_numbers<[1], [0], [0], [1], [0, 0, 1, 1], [], []>} : vector<8x50xf32>, vector<50x50xf32>, vector<8x50xf32> -> vector<8x50xf32>
    %31 = vector.broadcast %4 : vector<1x50xf32> to vector<8x50xf32>
    %32 = arith.addf %30, %31 : vector<8x50xf32>
    %33 = arith.mulf %32, %32 : vector<8x50xf32>
    %cst_17 = arith.constant dense<0.000000e+00> : vector<8xf32>
    %34 = vector.multi_reduction <add>, %33, %cst_17 [1] : vector<8x50xf32> to vector<8xf32>
    %35 = vector.shape_cast %34 : vector<8xf32> to vector<8x1xf32>
    %c0_18 = arith.constant 0 : index
    %c0_19 = arith.constant 0 : index
    %36 = vector.load %arg6[%c0_18, %c0_19] : memref<12x50xf32, #tpu.memory_space<vmem>>, vector<12x50xf32>
    %cst_20 = arith.constant dense<0.000000e+00> : vector<8x12xf32>
    %37 = tpu.matmul %32, %36, %cst_20 {dimension_numbers = #tpu.dot_dimension_numbers<[1], [1], [0], [0], [0, 0, 1, 0], [], []>} : vector<8x50xf32>, vector<12x50xf32>, vector<8x12xf32> -> vector<8x12xf32>
    %c0_21 = arith.constant 0 : index
    %c0_22 = arith.constant 0 : index
    %38 = vector.load %arg7[%c0_21, %c0_22] : memref<1x12xf32, #tpu.memory_space<vmem>>, vector<1x12xf32>
    %39 = vector.broadcast %35 : vector<8x1xf32> to vector<8x12xf32>
    %40 = vector.broadcast %38 : vector<1x12xf32> to vector<8x12xf32>
    %41 = arith.addf %39, %40 : vector<8x12xf32>
    %cst_23 = arith.constant 2.000000e+00 : f32
    %42 = vector.broadcast %cst_23 : f32 to vector<8x12xf32>
    %43 = arith.mulf %42, %37 : vector<8x12xf32>
    %44 = arith.subf %41, %43 : vector<8x12xf32>
    %cst_24 = arith.constant 0.000000e+00 : f32
    %45 = vector.broadcast %cst_24 : f32 to vector<8x12xf32>
    %46 = arith.maximumf %44, %45 : vector<8x12xf32>
    %cst_25 = arith.constant 1.000000e+00 : f32
    %47 = vector.broadcast %cst_25 : f32 to vector<8x12xf32>
    %48 = arith.addf %46, %47 : vector<8x12xf32>
    %49 = math.log %48 : vector<8x12xf32>
    %cst_26 = arith.constant 9.99999974E-6 : f32
    %50 = vector.broadcast %cst_26 : f32 to vector<8x12xf32>
    %51 = arith.addf %46, %50 : vector<8x12xf32>
    %52 = math.log %51 : vector<8x12xf32>
    %53 = arith.subf %49, %52 : vector<8x12xf32>
    %c0_27 = arith.constant 0 : index
    %c0_28 = arith.constant 0 : index
    %54 = vector.load %arg8[%c0_27, %c0_28] : memref<6x12xf32, #tpu.memory_space<vmem>>, vector<6x12xf32>
    %cst_29 = arith.constant dense<0.000000e+00> : vector<8x6xf32>
    %55 = tpu.matmul %53, %54, %cst_29 {dimension_numbers = #tpu.dot_dimension_numbers<[1], [1], [0], [0], [0, 0, 1, 0], [], []>} : vector<8x12xf32>, vector<6x12xf32>, vector<8x6xf32> -> vector<8x6xf32>
    %cst_30 = arith.constant dense<0xFF800000> : vector<8xf32>
    %56 = vector.multi_reduction <maximumf>, %55, %cst_30 [1] : vector<8x6xf32> to vector<8xf32>
    %57 = vector.shape_cast %56 : vector<8xf32> to vector<8x1xf32>
    %58 = vector.broadcast %57 : vector<8x1xf32> to vector<8x6xf32>
    %59 = arith.subf %55, %58 : vector<8x6xf32>
    %60 = math.exp %59 : vector<8x6xf32>
    %cst_31 = arith.constant dense<0.000000e+00> : vector<8xf32>
    %61 = vector.multi_reduction <add>, %60, %cst_31 [1] : vector<8x6xf32> to vector<8xf32>
    %62 = vector.shape_cast %61 : vector<8xf32> to vector<8x1xf32>
    %63 = vector.broadcast %62 : vector<8x1xf32> to vector<8x6xf32>
    %64 = arith.divf %60, %63 : vector<8x6xf32>
    %cst_32 = arith.constant 0.000000e+00 : f32
    %65 = vector.broadcast %cst_32 : f32 to vector<8x60xf32>
    %66 = tpu.concatenate %32, %53, %64, %65 in 1 : vector<8x50xf32>, vector<8x12xf32>, vector<8x6xf32>, vector<8x60xf32> -> vector<8x128xf32>
    %c0_33 = arith.constant 0 : index
    %c0_34 = arith.constant 0 : index
    %67 = vector.load %arg9[%c0_33, %c0_34] : memref<8x128xf32, #tpu.memory_space<vmem>>, vector<8x128xf32>
    tpu.vector_store %arg9[%c0_33, %c0_34], %66 {strides = array<i32>} : memref<8x128xf32, #tpu.memory_space<vmem>>, vector<8x128xf32>,
    return
  }
  func.func @transform_0(%arg0: i32) -> (i32, i32) {
    %c0_i32 = arith.constant 0 : i32
    %c0_i32_0 = arith.constant 0 : i32
    return %arg0, %c0_i32 : i32, i32
  }
  func.func @transform_1(%arg0: i32) -> (i32, i32) {
    %c0_i32 = arith.constant 0 : i32
    %c0_i32_0 = arith.constant 0 : i32
    %c0_i32_1 = arith.constant 0 : i32
    return %c0_i32, %c0_i32_0 : i32, i32
  }
  func.func @transform_2(%arg0: i32) -> (i32, i32) {
    %c0_i32 = arith.constant 0 : i32
    %c0_i32_0 = arith.constant 0 : i32
    %c0_i32_1 = arith.constant 0 : i32
    return %c0_i32, %c0_i32_0 : i32, i32
  }
  func.func @transform_3(%arg0: i32) -> (i32, i32) {
    %c0_i32 = arith.constant 0 : i32
    %c0_i32_0 = arith.constant 0 : i32
    %c0_i32_1 = arith.constant 0 : i32
    return %c0_i32, %c0_i32_0 : i32, i32
  }
  func.func @transform_4(%arg0: i32) -> (i32, i32) {
    %c0_i32 = arith.constant 0 : i32
    %c0_i32_0 = arith.constant 0 : i32
    %c0_i32_1 = arith.constant 0 : i32
    return %c0_i32, %c0_i32_0 : i32, i32
  }
  func.func @transform_5(%arg0: i32) -> (i32, i32) {
    %c0_i32 = arith.constant 0 : i32
    %c0_i32_0 = arith.constant 0 : i32
    %c0_i32_1 = arith.constant 0 : i32
    return %c0_i32, %c0_i32_0 : i32, i32
  }
  func.func @transform_6(%arg0: i32) -> (i32, i32) {
    %c0_i32 = arith.constant 0 : i32
    %c0_i32_0 = arith.constant 0 : i32
    %c0_i32_1 = arith.constant 0 : i32
    return %c0_i32, %c0_i32_0 : i32, i32
  }
  func.func @transform_7(%arg0: i32) -> (i32, i32) {
    %c0_i32 = arith.constant 0 : i32
    %c0_i32_0 = arith.constant 0 : i32
    %c0_i32_1 = arith.constant 0 : i32
    return %c0_i32, %c0_i32_0 : i32, i32
  }
  func.func @transform_8(%arg0: i32) -> (i32, i32) {
    %c0_i32 = arith.constant 0 : i32
    %c0_i32_0 = arith.constant 0 : i32
    return %arg0, %c0_i32 : i32, i32
  }
}

</mosaic_0001>

<bundles_post_ra>
// kernel: tpu_custom_call.1
= control target key start
LH: loop header
LB: loop body
LE: loop exit
PB: predicated region body
PF: predicated region fallthrough
CT: control target
= control target key end

     0   :  { %s2272_s0 = inlined_call_operand.vmem [shape: bf16[8,1536], index: 0, kind: input, shape index: {}]   ;;  %s2273_s1 = inlined_call_operand.vmem [shape: bf16[1536,50], index: 1, kind: input, shape index: {}]   ;;  %s2274_s2 = inlined_call_operand.vmem [shape: f32[1,50], index: 2, kind: input, shape index: {}]   ;;  %s2275_s3 = inlined_call_operand.vmem [shape: f32[50,50], index: 3, kind: input, shape index: {}]   ;;  %s2276_s4 = inlined_call_operand.vmem [shape: f32[1,50], index: 4, kind: input, shape index: {}]   ;;  %s2277_s5 = inlined_call_operand.vmem [shape: f32[12,50], index: 5, kind: input, shape index: {}]   ;;  %s2278_s6 = inlined_call_operand.vmem [shape: f32[1,12], index: 6, kind: input, shape index: {}]   ;;  %s2279_s7 = inlined_call_operand.vmem [shape: f32[6,12], index: 7, kind: input, shape index: {}]   ;;  %s2280_s8 = inlined_call_operand.hbm [shape: f32[8,128], index: 8, kind: output, shape index: {}]  }
   0x1   :  { %v1721_v0 = vld [vmem:[%s2273_s1 + $0x78] sm:$0xff]   ;;  %v1725_v4 = vld [vmem:[%s2273_s1 + $0x70] sm:$0xff]   ;;  %v1729_v8 = vld [vmem:[%s2273_s1 + $0x68] sm:$0xff]  }
   0x2   :  { %v1722_v1 = vld [vmem:[%s2273_s1 + $0xf8] sm:$0xff]   ;;  %1542 = vmatprep.subr.bf16.mxu0 %v1721_v0  ;;  %v1726_v5 = vld [vmem:[%s2273_s1 + $0xf0] sm:$0xff]   ;;  %v1730_v9 = vld [vmem:[%s2273_s1 + $0xe8] sm:$0xff]  }
   0x3   :  { %v1723_v2 = vld [vmem:[%s2273_s1 + $0x38] sm:$0xff]   ;;  %1564 = vmatprep.subr.bf16.mxu1 %v1722_v1  ;;  %v1727_v6 = vld [vmem:[%s2273_s1 + $0x30] sm:$0xff]   ;;  %v1731_v10 = vld [vmem:[%s2273_s1 + $0x28] sm:$0xff]  }
   0x4   :  { %v1724_v3 = vld [vmem:[%s2273_s1 + $0xb8] sm:$0xff]   ;;  %1543 = vmatpush3.bf16.msra.mxu0 %v1723_v2  ;;  %v1728_v7 = vld [vmem:[%s2273_s1 + $0xb0] sm:$0xff]   ;;  %v1732_v11 = vld [vmem:[%s2273_s1 + $0xa8] sm:$0xff]  }
   0x5   :  { %1565 = vmatpush3.bf16.msra.mxu1 %v1724_v3  ;;  %1544 = vmatprep.subr.bf16.mxu0 %v1725_v4  ;;  %v1733_v12 = vld [vmem:[%s2273_s1 + $0x60] sm:$0xff]   ;;  %v1737_v16 = vld [vmem:[%s2273_s1 + $0x58] sm:$0xff]   ;;  %v1741_v20 = vld [vmem:[%s2273_s1 + $0x50] sm:$0xff]  }
   0x6   :  { %1566 = vmatprep.subr.bf16.mxu1 %v1726_v5  ;;  %v1734_v13 = vld [vmem:[%s2273_s1 + $0xe0] sm:$0xff]   ;;  %v1738_v17 = vld [vmem:[%s2273_s1 + $0xd8] sm:$0xff]   ;;  %v1742_v21 = vld [vmem:[%s2273_s1 + $0xd0] sm:$0xff]  }
   0x7   :  { %v1735_v14 = vld [vmem:[%s2273_s1 + $0x20] sm:$0xff]   ;;  %v1739_v18 = vld [vmem:[%s2273_s1 + $0x18] sm:$0xff]   ;;  %v1743_v22 = vld [vmem:[%s2273_s1 + $0x10] sm:$0xff]  }
   0x8   :  { %1545 = vmatpush3.bf16.msra.mxu0 %v1727_v6  ;;  %v1736_v15 = vld [vmem:[%s2273_s1 + $0xa0] sm:$0xff]   ;;  %v1740_v19 = vld [vmem:[%s2273_s1 + $0x98] sm:$0xff]   ;;  %v1744_v23 = vld [vmem:[%s2273_s1 + $0x90] sm:$0xff]  }
   0x9   :  { %1567 = vmatpush3.bf16.msra.mxu1 %v1728_v7  ;;  %1546 = vmatprep.subr.bf16.mxu0 %v1729_v8  ;;  %v1745_v24 = vld [vmem:[%s2273_s1 + $0x48] sm:$0xff]   ;;  %v1749_v28 = vld [vmem:[%s2273_s1 + $0x40] sm:$0xff]   ;;  %v1757_v38 = vld [vmem:[%s2273_s1 + $0x178] sm:$0xff]  }
   0xa   :  { %1568 = vmatprep.subr.bf16.mxu1 %v1730_v9  ;;  %v1746_v25 = vld [vmem:[%s2273_s1 + $0xc8] sm:$0xff]   ;;  %v1750_v29 = vld [vmem:[%s2273_s1 + $0xc0] sm:$0xff]   ;;  %v1758_v39 = vld [vmem:[%s2273_s1 + $0x1f8] sm:$0xff]  }
   0xb   :  { %v1747_v26 = vld [vmem:[%s2273_s1 + $0x8] sm:$0xff]   ;;  %v1751_v30 = vld [vmem:[%s2273_s1] sm:$0xff]   ;;  %v1759_v40 = vld [vmem:[%s2273_s1 + $0x138] sm:$0xff]  }
   0xc   :  { %1547 = vmatpush3.bf16.msra.mxu0 %v1731_v10  ;;  %v1748_v27 = vld [vmem:[%s2273_s1 + $0x88] sm:$0xff]   ;;  %v1752_v31 = vld [vmem:[%s2273_s1 + $0x80] sm:$0xff]   ;;  %v1760_v41 = vld [vmem:[%s2273_s1 + $0x1b8] sm:$0xff]  }
   0xd   :  { %1569 = vmatpush3.bf16.msra.mxu1 %v1732_v11  ;;  %1548 = vmatprep.subr.bf16.mxu0 %v1733_v12  ;;  %v31_v32 = vld [vmem:[%s2272_s0] sm:$0xff]  ;;  %v32_v33 = vld [vmem:[%s2272_s0 + $0x8] sm:$0xff]  ;;  %v1761_v42 = vld [vmem:[%s2273_s1 + $0x170] sm:$0xff]  }
   0xe   :  { %1570 = vmatprep.subr.bf16.mxu1 %v1734_v13  ;;  %v1425_v34 = vcombine.low %v31_v32, %v31_v32  ;;  %v1426_v35 = vcombine.high %v31_v32, %v31_v32  ;;  %v1427_v36 = vcombine.low %v32_v33, %v32_v33  ;;  %v1428_v37 = vcombine.high %v32_v33, %v32_v33  ;;  %v1762_v43 = vld [vmem:[%s2273_s1 + $0x1f0] sm:$0xff]   ;;  %v1765_v46 = vld [vmem:[%s2273_s1 + $0x168] sm:$0xff]   ;;  %v1769_v50 = vld [vmem:[%s2273_s1 + $0x160] sm:$0xff]  }
   0xf   :  { %v1763_v44 = vld [vmem:[%s2273_s1 + $0x130] sm:$0xff]   ;;  %v1766_v47 = vld [vmem:[%s2273_s1 + $0x1e8] sm:$0xff]   ;;  %v1770_v51 = vld [vmem:[%s2273_s1 + $0x1e0] sm:$0xff]  }
  0x10   :  { %1549 = vmatpush3.bf16.msra.mxu0 %v1735_v14  ;;  %894 = vmatprep.mubr.bf16.mxu0 %v1426_v35  ;;  %v1764_v45 = vld [vmem:[%s2273_s1 + $0x1b0] sm:$0xff]   ;;  %v1767_v48 = vld [vmem:[%s2273_s1 + $0x128] sm:$0xff]   ;;  %v1771_v52 = vld [vmem:[%s2273_s1 + $0x120] sm:$0xff]  }
  0x11   :  { %1571 = vmatpush3.bf16.msra.mxu1 %v1736_v15  ;;  %1550 = vmatprep.subr.bf16.mxu0 %v1737_v16  ;;  %v1768_v49 = vld [vmem:[%s2273_s1 + $0x1a8] sm:$0xff]   ;;  %v1772_v53 = vld [vmem:[%s2273_s1 + $0x1a0] sm:$0xff]   ;;  %v1773_v54 = vld [vmem:[%s2273_s1 + $0x158] sm:$0xff]  }
  0x12   :  { %1572 = vmatprep.subr.bf16.mxu1 %v1738_v17  ;;  %934 = vmatprep.mubr.bf16.mxu1 %v1428_v37  ;;  %v1774_v55 = vld [vmem:[%s2273_s1 + $0x1d8] sm:$0xff]   ;;  %v1777_v58 = vld [vmem:[%s2273_s1 + $0x150] sm:$0xff]   ;;  %v1781_v62 = vld [vmem:[%s2273_s1 + $0x148] sm:$0xff]  }
  0x13   :  { %v1775_v56 = vld [vmem:[%s2273_s1 + $0x118] sm:$0xff]   ;;  %v1778_v59 = vld [vmem:[%s2273_s1 + $0x1d0] sm:$0xff]   ;;  %v1782_v63 = vld [vmem:[%s2273_s1 + $0x1c8] sm:$0xff]  }
  0x14   :  { %1551 = vmatpush3.bf16.msra.mxu0 %v1739_v18  ;;  %v1776_v57 = vld [vmem:[%s2273_s1 + $0x198] sm:$0xff]   ;;  %v1779_v60 = vld [vmem:[%s2273_s1 + $0x110] sm:$0xff]   ;;  %v1783_v0 = vld [vmem:[%s2273_s1 + $0x108] sm:$0xff]  }
  0x15   :  { %1573 = vmatpush3.bf16.msra.mxu1 %v1740_v19  ;;  %1552 = vmatprep.subr.bf16.mxu0 %v1741_v20  ;;  %v1780_v61 = vld [vmem:[%s2273_s1 + $0x190] sm:$0xff]   ;;  %v1784_v1 = vld [vmem:[%s2273_s1 + $0x188] sm:$0xff]   ;;  %v1785_v2 = vld [vmem:[%s2273_s1 + $0x140] sm:$0xff]  }
  0x16   :  { %1574 = vmatprep.subr.bf16.mxu1 %v1742_v21  ;;  %v1786_v3 = vld [vmem:[%s2273_s1 + $0x1c0] sm:$0xff]   ;;  %v33_v6 = vld [vmem:[%s2272_s0 + $0x10] sm:$0xff]  ;;  %v34_v9 = vld [vmem:[%s2272_s0 + $0x18] sm:$0xff] }
  0x17   :  { %v1787_v4 = vld [vmem:[%s2273_s1 + $0x100] sm:$0xff]   ;;  %v1429_v7 = vcombine.low %v33_v6, %v33_v6  ;;  %v1430_v8 = vcombine.high %v33_v6, %v33_v6  ;;  %v1431_v10 = vcombine.low %v34_v9, %v34_v9  ;;  %v1432_v11 = vcombine.high %v34_v9, %v34_v9  ;;  %v1793_v12 = vld [vmem:[%s2273_s1 + $0x278] sm:$0xff]   ;;  %v1797_v16 = vld [vmem:[%s2273_s1 + $0x270] sm:$0xff]  }
  0x18   :  { %1553 = vmatpush3.bf16.msra.mxu0 %v1743_v22  ;;  %v1788_v5 = vld [vmem:[%s2273_s1 + $0x180] sm:$0xff]   ;;  %v1794_v13 = vld [vmem:[%s2273_s1 + $0x2f8] sm:$0xff]   ;;  %v1798_v17 = vld [vmem:[%s2273_s1 + $0x2f0] sm:$0xff]  }
  0x19   :  { %1575 = vmatpush3.bf16.msra.mxu1 %v1744_v23  ;;  %1554 = vmatprep.subr.bf16.mxu0 %v1745_v24  ;;  %v1795_v14 = vld [vmem:[%s2273_s1 + $0x238] sm:$0xff]   ;;  %v1799_v18 = vld [vmem:[%s2273_s1 + $0x230] sm:$0xff]   ;;  %v1801_v20 = vld [vmem:[%s2273_s1 + $0x268] sm:$0xff]  }
  0x1a   :  { %1576 = vmatprep.subr.bf16.mxu1 %v1746_v25  ;;  %v1796_v15 = vld [vmem:[%s2273_s1 + $0x2b8] sm:$0xff]   ;;  %v1800_v19 = vld [vmem:[%s2273_s1 + $0x2b0] sm:$0xff]   ;;  %v1802_v21 = vld [vmem:[%s2273_s1 + $0x2e8] sm:$0xff]  }
  0x1b   :  { %v1803_v22 = vld [vmem:[%s2273_s1 + $0x228] sm:$0xff]   ;;  %v1805_v24 = vld [vmem:[%s2273_s1 + $0x260] sm:$0xff]   ;;  %v1813_v32 = vld [vmem:[%s2273_s1 + $0x250] sm:$0xff]  }
  0x1c   :  { %1555 = vmatpush3.bf16.msra.mxu0 %v1747_v26  ;;  %v1804_v23 = vld [vmem:[%s2273_s1 + $0x2a8] sm:$0xff]   ;;  %v1806_v25 = vld [vmem:[%s2273_s1 + $0x2e0] sm:$0xff]   ;;  %v1814_v33 = vld [vmem:[%s2273_s1 + $0x2d0] sm:$0xff]  }
  0x1d   :  { %1577 = vmatpush3.bf16.msra.mxu1 %v1748_v27  ;;  %1556 = vmatprep.subr.bf16.mxu0 %v1749_v28  ;;  %v1807_v26 = vld [vmem:[%s2273_s1 + $0x220] sm:$0xff]   ;;  %v1809_v28 = vld [vmem:[%s2273_s1 + $0x258] sm:$0xff]   ;;  %v1816_v35 = vld [vmem:[%s2273_s1 + $0x290] sm:$0xff]  }
  0x1e   :  { %1578 = vmatprep.subr.bf16.mxu1 %v1750_v29  ;;  %v1808_v27 = vld [vmem:[%s2273_s1 + $0x2a0] sm:$0xff]   ;;  %v1810_v29 = vld [vmem:[%s2273_s1 + $0x2d8] sm:$0xff]   ;;  %v1818_v37 = vld [vmem:[%s2273_s1 + $0x2c8] sm:$0xff]  }
  0x20   :  { %1557 = vmatpush3.bf16.msra.mxu0 %v1751_v30  ;;  %v1811_v30 = vld [vmem:[%s2273_s1 + $0x218] sm:$0xff]  }
  0x21   :  { %1579 = vmatpush3.bf16.msra.mxu1 %v1752_v31  ;;  %1586 = vmatprep.subr.bf16.mxu0 %v1757_v38  ;;  %v1812_v31 = vld [vmem:[%s2273_s1 + $0x298] sm:$0xff]   ;;  %v1819_v38 = vld [vmem:[%s2273_s1 + $0x208] sm:$0xff]  }
  0x22   :  { %1608 = vmatprep.subr.bf16.mxu1 %v1758_v39  ;;  %v1820_v39 = vld [vmem:[%s2273_s1 + $0x288] sm:$0xff]  }
  0x23   :  { %895 = vmatmul.mubr.bf16.vlgmr.msra.gmra.mxu0 %v1425_v34  ;;  %v1815_v34 = vld [vmem:[%s2273_s1 + $0x210] sm:$0xff]  }
  0x24   :  { %935 = vmatmul.mubr.bf16.vlgmr.msra.gmra.mxu1 %v1427_v36  ;;  %1587 = vmatpush3.bf16.msra.mxu0 %v1759_v40  ;;  %v1817_v36 = vld [vmem:[%s2273_s1 + $0x248] sm:$0xff]   ;;  %v1821_v40 = vld [vmem:[%s2273_s1 + $0x240] sm:$0xff]  }
  0x25   :  { %1609 = vmatpush3.bf16.msra.mxu1 %v1760_v41  ;;  %1588 = vmatprep.subr.bf16.mxu0 %v1761_v42  ;;  %v1822_v41 = vld [vmem:[%s2273_s1 + $0x2c0] sm:$0xff]  }
  0x26   :  { %1610 = vmatprep.subr.bf16.mxu1 %v1762_v43  ;;  %974 = vmatprep.mubr.bf16.mxu0 %v1430_v8  ;;  %v1823_v42 = vld [vmem:[%s2273_s1 + $0x200] sm:$0xff]  }
  0x27   :  { %1014 = vmatprep.mubr.bf16.mxu1 %v1432_v11  ;;  %v1824_v43 = vld [vmem:[%s2273_s1 + $0x280] sm:$0xff]  }
  0x28   :  { %1589 = vmatpush3.bf16.msra.mxu0 %v1763_v44  ;;  %v35_v44 = vld [vmem:[%s2272_s0 + $0x20] sm:$0xff] }
  0x29   :  { %1611 = vmatpush3.bf16.msra.mxu1 %v1764_v45  ;;  %1590 = vmatprep.subr.bf16.mxu0 %v1765_v46  ;;  %v36_v45 = vld [vmem:[%s2272_s0 + $0x28] sm:$0xff]  ;;  %v1433_v46 = vcombine.low %v35_v44, %v35_v44 }
  0x2a   :  { %1612 = vmatprep.subr.bf16.mxu1 %v1766_v47  ;;  %v1434_v47 = vcombine.high %v35_v44, %v35_v44 }
  0x2c   :  { %1591 = vmatpush3.bf16.msra.mxu0 %v1767_v48  ;;  %v1435_v48 = vcombine.low %v36_v45, %v36_v45 }
  0x2d   :  { %1613 = vmatpush3.bf16.msra.mxu1 %v1768_v49  ;;  %1592 = vmatprep.subr.bf16.mxu0 %v1769_v50  ;;  %v1436_v49 = vcombine.high %v36_v45, %v36_v45 }
  0x2e   :  { %1614 = vmatprep.subr.bf16.mxu1 %v1770_v51 }
  0x30   :  { %1593 = vmatpush3.bf16.msra.mxu0 %v1771_v52 }
  0x31   :  { %1615 = vmatpush3.bf16.msra.mxu1 %v1772_v53  ;;  %1594 = vmatprep.subr.bf16.mxu0 %v1773_v54 }
  0x32   :  { %1616 = vmatprep.subr.bf16.mxu1 %v1774_v55 }
  0x34   :  { %1595 = vmatpush3.bf16.msra.mxu0 %v1775_v56 }
  0x35   :  { %1617 = vmatpush3.bf16.msra.mxu1 %v1776_v57  ;;  %1596 = vmatprep.subr.bf16.mxu0 %v1777_v58 }
  0x36   :  { %1618 = vmatprep.subr.bf16.mxu1 %v1778_v59 }
  0x38   :  { %1597 = vmatpush3.bf16.msra.mxu0 %v1779_v60 }
  0x39   :  { %1619 = vmatpush3.bf16.msra.mxu1 %v1780_v61  ;;  %1598 = vmatprep.subr.bf16.mxu0 %v1781_v62 }
  0x3a   :  { %1620 = vmatprep.subr.bf16.mxu1 %v1782_v63 }
  0x3c   :  { %1599 = vmatpush3.bf16.msra.mxu0 %v1783_v0 }
  0x3d   :  { %1621 = vmatpush3.bf16.msra.mxu1 %v1784_v1  ;;  %1600 = vmatprep.subr.bf16.mxu0 %v1785_v2 }
  0x3e   :  { %1622 = vmatprep.subr.bf16.mxu1 %v1786_v3 }
  0x40   :  { %1601 = vmatpush3.bf16.msra.mxu0 %v1787_v4 }
  0x41   :  { %1623 = vmatpush3.bf16.msra.mxu1 %v1788_v5  ;;  %1630 = vmatprep.subr.bf16.mxu0 %v1793_v12 }
  0x42   :  { %1652 = vmatprep.subr.bf16.mxu1 %v1794_v13 }
  0x43   :  { %975 = vmatmul.mubr.bf16.vlgmr.msra.gmra.mxu0 %v1429_v7 }
  0x44   :  { %1015 = vmatmul.mubr.bf16.vlgmr.msra.gmra.mxu1 %v1431_v10  ;;  %1631 = vmatpush3.bf16.msra.mxu0 %v1795_v14 }
  0x45   :  { %1653 = vmatpush3.bf16.msra.mxu1 %v1796_v15  ;;  %1632 = vmatprep.subr.bf16.mxu0 %v1797_v16 }
  0x46   :  { %1654 = vmatprep.subr.bf16.mxu1 %v1798_v17 }
  0x48   :  { %1633 = vmatpush3.bf16.msra.mxu0 %v1799_v18 }
  0x49   :  { %1655 = vmatpush3.bf16.msra.mxu1 %v1800_v19  ;;  %1634 = vmatprep.subr.bf16.mxu0 %v1801_v20 }
  0x4a   :  { %1656 = vmatprep.subr.bf16.mxu1 %v1802_v21 }
  0x4c   :  { %1635 = vmatpush3.bf16.msra.mxu0 %v1803_v22 }
  0x4d   :  { %1657 = vmatpush3.bf16.msra.mxu1 %v1804_v23  ;;  %1636 = vmatprep.subr.bf16.mxu0 %v1805_v24 }
  0x4e   :  { %1658 = vmatprep.subr.bf16.mxu1 %v1806_v25 }
  0x50   :  { %1637 = vmatpush3.bf16.msra.mxu0 %v1807_v26 }
  0x51   :  { %1659 = vmatpush3.bf16.msra.mxu1 %v1808_v27  ;;  %1638 = vmatprep.subr.bf16.mxu0 %v1809_v28 }
  0x52   :  { %1660 = vmatprep.subr.bf16.mxu1 %v1810_v29 }
  0x54   :  { %1639 = vmatpush3.bf16.msra.mxu0 %v1811_v30 }
  0x55   :  { %1661 = vmatpush3.bf16.msra.mxu1 %v1812_v31  ;;  %1640 = vmatprep.subr.bf16.mxu0 %v1813_v32 }
  0x56   :  { %1662 = vmatprep.subr.bf16.mxu1 %v1814_v33 }
  0x58   :  { %1641 = vmatpush3.bf16.msra.mxu0 %v1815_v34 }
  0x59   :  { %1663 = vmatpush3.bf16.msra.mxu1 %v1816_v35  ;;  %1642 = vmatprep.subr.bf16.mxu0 %v1817_v36 }
  0x5a   :  { %1664 = vmatprep.subr.bf16.mxu1 %v1818_v37 }
  0x5c   :  { %1643 = vmatpush3.bf16.msra.mxu0 %v1819_v38 }
  0x5d   :  { %1665 = vmatpush3.bf16.msra.mxu1 %v1820_v39  ;;  %1644 = vmatprep.subr.bf16.mxu0 %v1821_v40 }
  0x5e   :  { %1666 = vmatprep.subr.bf16.mxu1 %v1822_v41 }
  0x60   :  { %1645 = vmatpush3.bf16.msra.mxu0 %v1823_v42 }
  0x61   :  { %13 = vsyncpa [#allocation3], 0  ;;  %1667 = vmatpush3.bf16.msra.mxu1 %v1824_v43  ;;  %1054 = vmatprep.mubr.bf16.mxu0 %v1434_v47  ;;  %v1424_v3 = vld [vmem:[%s2274_s2] ss:$0 sm:$0xff]  ;;  %vm1102_vm0 = vcmask 408576   ;;  %vm1130_vm1 = vcmask 1041408  }
  0x62   :  { %1094 = vmatprep.mubr.bf16.mxu1 %v1436_v49  ;;  %v236_v26 = vld [vmem:[%s2275_s3 + $0x30] sm:$0x3]  ;;  %v1861_v27 = vmov 0.0   ;;  %v235_v28 = vld [vmem:[%s2275_s3 + $0x28] sm:$0xff]  ;;  %vm1862_vm2 = vmmov 0   ;;  %v234_v29 = vld [vmem:[%s2275_s3 + $0x20] sm:$0xff] }
  0x63   :  { %1055 = vmatmul.mubr.bf16.vlgmr.msra.gmra.mxu0 %v1433_v46  ;;  %1687 = vmatprep.subr.mxu0 %v1861_v27  ;;  %v233_v30 = vld [vmem:[%s2275_s3 + $0x18] sm:$0xff]  ;;  %v232_v31 = vld [vmem:[%s2275_s3 + $0x10] sm:$0xff]  ;;  %v231_v32 = vld [vmem:[%s2275_s3 + $0x8] sm:$0xff]  ;;  %vm1308_vm3 = vcmask 97280   ;;  %vm1385_vm4 = vcmask 48128   ;;  %vm1405_vm5 = vcmask 506880  }
  0x64   :  { %1095 = vmatmul.mubr.bf16.vlgmr.msra.gmra.mxu1 %v1435_v48  ;;  %1704 = vmatprep.subr.mxu1 %v1861_v27  ;;  %v230_v33 = vld [vmem:[%s2275_s3] sm:$0xff]  ;;  %v1209_v34 = vld [vmem:[%s2277_s5 + $0x8] sm:$0xf]  ;;  %s1865_s9 = smov [#allocation2]   ;;  %vm1407_vm6 = vcmask 556032  }
  0x65   :  { %1688 = vmatpush3.msk.msra.mxu0 %vm1130_vm1, %v236_v26  ;;  %1701 = vmatprep.mubr.msk.f32.mxu0 %vm1862_vm2, %v1861_v27  ;;  %v1208_v35 = vld [vmem:[%s2277_s5] sm:$0xff]  ;;  %s1416_s10 = sshll.u32 %s1865_s9, 4  ;;  %s1417_s10 = int_to_ptr.vmem [resolvable:$true] %s1416_s10 }
  0x66   :  { %1689 = vmatprep.subr.mxu0 %v1861_v27  ;;  %1708 = vmatprep.mubr.msk.f32.mxu1 %vm1862_vm2, %v1861_v27  ;;  %v1533_v48 = vld [vmem:[%s2276_s4] ss:$0 sm:$0xff]  ;;  %s1839_s0 = scalar_lea.vmem %s1417_s10, 128  ;;  %p1844_p1 = scmp.lt.s32.totalorder %s1417_s10, %s1417_s10 }
  0x67   :  { %1690 = vmatpush3.msra.mxu0 %v235_v28  ;;  %1705 = vmatpush3.xpose.msk.msra.mxu1 %vm1102_vm0, %v1209_v34  ;;  %p1840_p0 = scmp.ne.s32.totalorder %s1417_s10, %s1839_s0  ;;  %p1845_p2 = scmp.lt.s32.totalorder %s1839_s0, %s1839_s0 }
  0x68   :  { %1691 = vmatprep.subr.mxu0 %v1861_v27  ;;  %1706 = vmatprep.subr.mxu1 %v1861_v27 }
  0x69   :  { %1692 = vmatpush3.msra.mxu0 %v234_v29  ;;  %p1846_p3 = por %p1845_p2, %p1844_p1 }
  0x6a   :  { %1693 = vmatprep.subr.mxu0 %v1861_v27 }
  0x6b   :  { %1694 = vmatpush3.msra.mxu0 %v233_v30  ;;  %1707 = vmatpush3.xpose.msk.msra.mxu1 %vm1102_vm0, %v1208_v35  ;;  %p1847_p4 = pnand %p1846_p3, %p1840_p0 }
  0x6c   :  { %1695 = vmatprep.subr.mxu0 %v1861_v27  ;;  %1711 = vmatprep.subr.mxu1 %v1861_v27 }
  0x6d   :  { %1696 = vmatpush3.msra.mxu0 %v232_v31 }
  0x6e   :  { %1697 = vmatprep.subr.mxu0 %v1861_v27 }
  0x6f   :  { %1698 = vmatpush3.msra.mxu0 %v231_v32 }
  0x70   :  { %1699 = vmatprep.subr.mxu0 %v1861_v27 }
  0x71   :  { %1700 = vmatpush3.msra.mxu0 %v230_v33 }
  0xe3   :  { %v1558_v50 = vpop.f32.mrf.mxu0 }
  0xe4   :  { %v1580_v51 = vpop.f32.mrf.mxu1 }
  0xe5   :  { %v1559_v52 = vpop.f32.mrf.mxu0 }
  0xe6   :  { %v1581_v53 = vpop.f32.mrf.mxu1  ;;  %v1560_v2 = vadd.f32 %v1559_v52, %v1558_v50 }
  0xe7   :  { %v1561_v54 = vpop.f32.mrf.mxu0  ;;  %v1582_v5 = vadd.f32 %v1581_v53, %v1580_v51 }
  0xe8   :  { %v1583_v55 = vpop.f32.mrf.mxu1  ;;  %v897_v4 = vadd.f32 %v1560_v2, %v1424_v3  ;;  %v1307_v54 = vld [vmem:[%s2279_s7] sm:$0x3f]  ;;  %s1864_s7 = smov 62  }
  0xe9   :  { %v1562_v56 = vpop.f32.mrf.mxu0  ;;  %v1539_v55 = vld [vmem:[%s2278_s6] ss:$0 sm:$0xff]  ;;  %s1863_s6 = smov 50  }
  0xea   :  { %v1584_v57 = vpop.f32.mrf.mxu1  ;;  %v937_v7 = vadd.f32 %v1582_v5, %v897_v4 }
 0x103   :  { %v1602_v58 = vpop.f32.mrf.mxu0 }
 0x104   :  { %v1624_v59 = vpop.f32.mrf.mxu1 }
 0x105   :  { %v1603_v60 = vpop.f32.mrf.mxu0 }
 0x106   :  { %v1625_v61 = vpop.f32.mrf.mxu1  ;;  %v1604_v6 = vadd.f32 %v1603_v60, %v1602_v58 }
 0x107   :  { %v1605_v62 = vpop.f32.mrf.mxu0  ;;  %v1626_v9 = vadd.f32 %v1625_v61, %v1624_v59 }
 0x108   :  { %v1627_v63 = vpop.f32.mrf.mxu1  ;;  %v977_v8 = vadd.f32 %v1604_v6, %v937_v7 }
 0x109   :  { %v1606_v0 = vpop.f32.mrf.mxu0 }
 0x10a   :  { %v1628_v1 = vpop.f32.mrf.mxu1  ;;  %v1017_v13 = vadd.f32 %v1626_v9, %v977_v8 }
 0x123   :  { %v1646_v10 = vpop.f32.mrf.mxu0 }
 0x124   :  { %v1668_v11 = vpop.f32.mrf.mxu1 }
 0x125   :  { %v1647_v12 = vpop.f32.mrf.mxu0 }
 0x126   :  { %v1648_v14 = vadd.f32 %v1647_v12, %v1646_v10  ;;  %v1669_v15 = vpop.f32.mrf.mxu1 }
 0x127   :  { %v1649_v16 = vpop.f32.mrf.mxu0  ;;  %v1670_v18 = vadd.f32 %v1669_v15, %v1668_v11 }
 0x128   :  { %v1057_v17 = vadd.f32 %v1648_v14, %v1017_v13  ;;  %v1671_v19 = vpop.f32.mrf.mxu1 }
 0x129   :  { %v1650_v20 = vpop.f32.mrf.mxu0 }
 0x12a   :  { %v1097_v21 = vadd.f32 %v1670_v18, %v1057_v17  ;;  %v1672_v22 = vpop.f32.mrf.mxu1 }
 0x12c   :  { %v1103_v23 = vsel %vm1102_vm0, %v1097_v21, 0.0  ;;  %v1108_v24 = vmul.f32 %v1097_v21, %v1097_v21 }
 0x12d   :  { %1104 = vadd.xlane.f32.xlu0 %v1103_v23 }
 0x12e   :  { %v1109_v25 = vsel %vm1102_vm0, %v1108_v24, 0.0 }
 0x131   :  { %1110 = vadd.xlane.f32.xlu0 %v1109_v25 }
 0x1b6   :  { %v1105_v36 = vpop.xlane.xlu0 %1104 }
 0x1b7   :  { %v1107_v37 = vmul.f32 0.02, %v1105_v36 }
 0x1b9   :  { %v1113_v39 = vmul.f32 %v1107_v37, %v1107_v37  ;;  %v1116_v44 = vsub.f32 %v1097_v21, %v1107_v37 }
 0x1ba   :  { %v1111_v38 = vpop.xlane.xlu0 %1110 }
 0x1bb   :  { %v1112_v40 = vmul.f32 0.02, %v1111_v38 }
 0x1bd   :  { %v1114_v41 = vsub.f32 %v1112_v40, %v1113_v39 }
 0x1bf   :  { %v1115_v42 = vmax.f32 %v1114_v41, 0.0 }
 0x1c1   :  { %v1117_v43 = vadd.f32 1e-05, %v1115_v42 }
 0x1c3   :  { %1829 = vrsqrt.f32 %v1117_v43 }
 0x1d0   :  { %v1830_v45 = vpop.eup %1829 }
 0x1d1   :  { %v1119_v46 = vmul.f32 %v1830_v45, %v1116_v44 }
 0x1d3   :  { %v1120_v47 = vmax.f32 %v1119_v46, 0.0 }
 0x1d5   :  { %1702 = vmatmul.mubr.msk.f32.vlgmr.msra.gmra.mxu0 %vm1102_vm0, %v1120_v47 }
 0x295   :  { %v1200_v49 = vpop.f32.mrf.mxu0 }
 0x296   :  { %v1201_v50 = vadd.f32 %v1533_v48, %v1200_v49 }
 0x297   :  { %v1703_v51 = vpop.f32.mrf.mxu0 }
 0x298   :  { %1709 = vmatmul.mubr.msk.f32.vlgmr.msra.gmra.mxu1 %vm1102_vm0, %v1201_v50  ;;  %v1204_v52 = vmul.f32 %v1201_v50, %v1201_v50 }
 0x299   :  { %1713 = vmatprep.mubr.msk.f32.mxu1 %vm1862_vm2, %v1861_v27  ;;  %1712 = vmatpush3.xpose.msk.msra.mxu1 %vm1308_vm3, %v1307_v54 }
 0x29a   :  { %v1205_v53 = vsel %vm1102_vm0, %v1204_v52, 0.0 }
 0x29b   :  { %1206 = vadd.xlane.f32.xlu1 %v1205_v53 }
 0x324   :  { %v1207_v56 = vpop.xlane.xlu1 %1206 }
 0x325   :  { %v1296_v58 = vadd.f32 %v1539_v55, %v1207_v56 }
 0x358   :  { %v1285_v57 = vpop.f32.mrf.mxu1 }
 0x359   :  { %v1297_v59 = vmul.f32 2.0, %v1285_v57 }
 0x35a   :  { %v1710_v60 = vpop.f32.mrf.mxu1 }
 0x35b   :  { %v1298_v61 = vsub.f32 %v1296_v58, %v1297_v59 }
 0x35d   :  { %v1299_v62 = vmax.f32 %v1298_v61, 0.0 }
 0x35f   :  { %v1300_v63 = vadd.f32 1.0, %v1299_v62  ;;  %v1303_v0 = vadd.f32 1e-05, %v1299_v62 }
 0x361   :  { %1831 = vlog2.f32 %v1300_v63 }
 0x362   :  { %1833 = vlog2.f32 %v1303_v0 }
 0x36e   :  { %v1832_v1 = vpop.eup %1831 }
 0x36f   :  { %v1834_v2 = vpop.eup %1833  ;;  %v1302_v3 = vmul.f32 0.6931472, %v1832_v1 }
 0x370   :  { %v1305_v4 = vmul.f32 0.6931472, %v1834_v2 }
 0x372   :  { %v1306_v5 = vsub.f32 %v1302_v3, %v1305_v4 }
 0x374   :  { %1714 = vmatmul.mubr.msk.f32.vlgmr.msra.gmra.mxu1 %vm1308_vm3, %v1306_v5 }
 0x434   :  { %v1381_v6 = vpop.f32.mrf.mxu1 }
 0x435   :  { %v1386_v7 = vsel %vm1385_vm4, %v1381_v6, -inf }
 0x436   :  { %1387 = vmax.xlane.f32.xlu1 %v1386_v7  ;;  %v1715_v8 = vpop.f32.mrf.mxu1 }
 0x447   :  { %1397 = vrot.lane.b32.xlu1 %v1306_v5, %s1863_s6 }
 0x4bf   :  { %v1388_v9 = vpop.xlane.xlu1 %1387 }
 0x4c0   :  { %v1389_v10 = vsub.f32 %v1381_v6, %v1388_v9 }
 0x4c2   :  { %v1390_v11 = vmul.f32 1.442695, %v1389_v10 }
 0x4c3   :  { %v1398_v17 = vpop.permute.xlu1 %1397 }
 0x4c4   :  { %1835 = vpow2.f32 %v1390_v11  ;;  %v1404_v18 = vsel %vm1102_vm0, %v1201_v50, %v1398_v17 }
 0x4d1   :  { %v1836_v12 = vpop.eup %1835 }
 0x4d2   :  { %v1392_v13 = vsel %vm1385_vm4, %v1836_v12, 0.0 }
 0x4d3   :  { %1393 = vadd.xlane.f32.xlu0 %v1392_v13 }
 0x55c   :  { %v1394_v14 = vpop.xlane.xlu0 %1393 }
 0x55d   :  { %1837 = vrcp.f32 %v1394_v14 }
 0x56a   :  { %v1838_v15 = vpop.eup %1837 }
 0x56b   :  { %v1396_v16 = vmul.f32 %v1838_v15, %v1836_v12 }
 0x56d   :  { %1401 = vrot.lane.b32.xlu0 %v1396_v16, %s1864_s7 }
 0x5df   :  { %v1402_v19 = vpop.permute.xlu0 %1401 }
 0x5e0   :  { %v1406_v20 = vsel %vm1405_vm5, %v1404_v18, %v1402_v19 }
 0x5e1   :  { %v1408_v21 = vsel %vm1407_vm6, %v1406_v20, 0.0 }
 0x5e2   :  { %1409 = vst [vmem:[#allocation2] sm:$0xff] %v1408_v21 }
 0x5e3   :  { %1850 = shalt.err (!%p1847_p4)
}
 0x5e4   :  { %1419 = dma.vmem_to_hbm [thread:$0]  %s1417_s10, 128, %s2280_s8, [#allocation3]  }
 0x5e5   :  { %1859 = dma.done.wait [#allocation3], 128  }
 0x5e6   :  { %1860 = vsyncadd [#allocation3], 4294967168 }
 0x5e7   :  { %1423 = vsyncpa [#allocation3], 1 }

</bundles_post_ra>
